<compile_context>
chip_gen: v7x
topology: tpu7x:2x2x1
jax: 0.10.0
libtpu: 0.0.40
codegen_flags: <defaults>
</compile_context>

<pallas_src>
import math

import jax
import jax.numpy as jnp
from jax import lax
from jax.experimental import pallas as pl
from jax.experimental.pallas import tpu as pltpu


def _biasfree_ln_kernel(x_ref, o_ref, *, eps):
    x = x_ref[...].astype(jnp.float32)
    mu = jnp.mean(x, axis=-1, keepdims=True)
    var = jnp.mean(jnp.square(x - mu), axis=-1, keepdims=True)   # unbiased=False
    # BiasFree: numerator is x itself (mean is NOT subtracted).
    o_ref[...] = (x * lax.rsqrt(var + eps)).astype(o_ref.dtype)


def _choose_row_tile(M, max_rows=1024):
    """Fixed 8-aligned row tile, capped at max_rows, aiming for >= 2 grid steps."""
    if M <= 8:
        return M                      # full-dim block (always a legal BlockSpec)
    half = (M + 1) // 2
    return min(max_rows, max(8, (half // 8) * 8))


def biasfree_layernorm(x, eps=1e-5, max_rows=1024):
    """BiasFree_LayerNorm over the last dim of an arbitrary-rank tensor."""
    orig_shape = x.shape
    C = orig_shape[-1]
    M = int(math.prod(orig_shape[:-1])) if len(orig_shape) > 1 else 1
    x2d = x.reshape(M, C)

    tm = _choose_row_tile(M, max_rows)
    grid = (pl.cdiv(M, tm),)

    out2d = pl.pallas_call(
        lambda x_ref, o_ref: _biasfree_ln_kernel(x_ref, o_ref, eps=eps),
        out_shape=jax.ShapeDtypeStruct((M, C), x.dtype),
        grid=grid,
        in_specs=[pl.BlockSpec((tm, C), lambda i: (i, 0))],
        out_specs=pl.BlockSpec((tm, C), lambda i: (i, 0)),
        compiler_params=pltpu.CompilerParams(
            dimension_semantics=("parallel",),
            vmem_limit_bytes=32 * 1024 * 1024,   # fits v7x scoped default too
        ),
    )(x2d)
    return out2d.reshape(orig_shape)


# Pure-JAX reference for in-script verification.
def _reference(x, eps=1e-5):
    var = jnp.var(x, axis=-1, keepdims=True)     # ddof=0 == unbiased=False
    return x / jnp.sqrt(var + eps)


if __name__ == "__main__":
    key = jax.random.PRNGKey(0)
    k1, k2 = jax.random.split(key)

    # Histoformer applies this norm to (B, H*W, C) tensors; dim=48 is typical.
    x = jax.random.normal(k1, (2, 16 * 16, 48), jnp.float32)     # M=512 -> 2 row tiles
    y = jax.block_until_ready(jax.jit(biasfree_layernorm)(x))
    assert y.shape == x.shape
    err = float(jnp.max(jnp.abs(y - _reference(x))))
    assert err < 1e-4, f"mismatch vs reference: max abs err = {err}"

    # Ragged case: row count not a multiple of the tile (exercises masked tail block).
    xr = jax.random.normal(k2, (3, 17, 48), jnp.float32)         # M=51
    yr = jax.block_until_ready(jax.jit(biasfree_layernorm)(xr))
    errr = float(jnp.max(jnp.abs(yr - _reference(xr))))
    assert errr < 1e-4, f"ragged mismatch vs reference: max abs err = {errr}"

    print("KERNEL_OK")
</pallas_src>

<mosaic_0001>
module attributes {stable_mosaic.version = 11 : i64} {
  func.func @_lambda_(%arg0: i32, %arg1: memref<256x48xf32, #tpu.memory_space<vmem>>, %arg2: memref<256x48xf32, #tpu.memory_space<vmem>>) attributes {dimension_semantics = [#tpu.dimension_semantics<parallel>], iteration_bounds = array<i64: 2>, scalar_prefetch = 0 : i64, scratch_operands = 0 : i64, tpu.core_type = #tpu.core_type<tc>, window_params = [{transform_indices = @transform_0, window_bounds = array<i64: 256, 48>}, {transform_indices = @transform_1, window_bounds = array<i64: 256, 48>}]} {
    %c0 = arith.constant 0 : index
    %c0_0 = arith.constant 0 : index
    %0 = vector.load %arg1[%c0, %c0_0] : memref<256x48xf32, #tpu.memory_space<vmem>>, vector<256x48xf32>
    %cst = arith.constant dense<0.000000e+00> : vector<256xf32>
    %1 = vector.multi_reduction <add>, %0, %cst [1] : vector<256x48xf32> to vector<256xf32>
    %2 = vector.shape_cast %1 : vector<256xf32> to vector<256x1xf32>
    %cst_1 = arith.constant 4.800000e+01 : f32
    %3 = vector.broadcast %cst_1 : f32 to vector<256x1xf32>
    %4 = arith.divf %2, %3 : vector<256x1xf32>
    %5 = vector.broadcast %4 : vector<256x1xf32> to vector<256x48xf32>
    %6 = arith.subf %0, %5 : vector<256x48xf32>
    %7 = arith.mulf %6, %6 : vector<256x48xf32>
    %cst_2 = arith.constant dense<0.000000e+00> : vector<256xf32>
    %8 = vector.multi_reduction <add>, %7, %cst_2 [1] : vector<256x48xf32> to vector<256xf32>
    %9 = vector.shape_cast %8 : vector<256xf32> to vector<256x1xf32>
    %cst_3 = arith.constant 4.800000e+01 : f32
    %10 = vector.broadcast %cst_3 : f32 to vector<256x1xf32>
    %11 = arith.divf %9, %10 : vector<256x1xf32>
    %cst_4 = arith.constant 9.99999974E-6 : f32
    %12 = vector.broadcast %cst_4 : f32 to vector<256x1xf32>
    %13 = arith.addf %11, %12 : vector<256x1xf32>
    %14 = math.rsqrt %13 : vector<256x1xf32>
    %15 = vector.broadcast %14 : vector<256x1xf32> to vector<256x48xf32>
    %16 = arith.mulf %0, %15 : vector<256x48xf32>
    %c0_5 = arith.constant 0 : index
    %c0_6 = arith.constant 0 : index
    %17 = vector.load %arg2[%c0_5, %c0_6] : memref<256x48xf32, #tpu.memory_space<vmem>>, vector<256x48xf32>
    tpu.vector_store %arg2[%c0_5, %c0_6], %16 {strides = array<i32>} : memref<256x48xf32, #tpu.memory_space<vmem>>, vector<256x48xf32>,
    return
  }
  func.func @transform_0(%arg0: i32) -> (i32, i32) {
    %c0_i32 = arith.constant 0 : i32
    %c0_i32_0 = arith.constant 0 : i32
    return %arg0, %c0_i32 : i32, i32
  }
  func.func @transform_1(%arg0: i32) -> (i32, i32) {
    %c0_i32 = arith.constant 0 : i32
    %c0_i32_0 = arith.constant 0 : i32
    return %arg0, %c0_i32 : i32, i32
  }
}

</mosaic_0001>

<bundles_post_ra>
// kernel: biasfree_layernorm.1
= control target key start
LH: loop header
LB: loop body
LE: loop exit
PB: predicated region body
PF: predicated region fallthrough
CT: control target
= control target key end

     0   :  { %s759_s6 = smov 0   ;;  %s1107_s0 = inlined_call_operand.vmem [shape: f32[512,48], index: 0, kind: input, shape index: {}]   ;;  %s1108_s1 = inlined_call_operand.vmem [shape: f32[512,48], index: 1, kind: output, shape index: {}]  }
   0x1 LB: > { %s658_s7 = sadd.s32 4294967295, %s747_s6   ;;  %p662_p0 = scmp.ge.s32.totalorder %s747_s6, 1  ;;  %s747_s6 = sphi %s759_s6, %s11_s6  }
   0x2   : > { %p88_p1 = scmp.lt.s32.totalorder %s747_s6, 3 }
   0x4   : > { %p89_p2 = pnand %p662_p0, %p88_p1 }
   0x5   : > { %s663_s8 = sshll.u32 (!%p89_p2), %s658_s7, 5  ;;  %vm152_vm0 = vcmask (!%p89_p2), 392192  }
   0x6   : > { %92 = sbr.rel (%p89_p2) target bundleno = 391 (0x187), region = 24  ;;  %p109_p3 = scmp.lt.s32.totalorder (!%p89_p2), %s663_s8, 63 }
   0xd   : > { %s1110_s8 = smov (!%p109_p3, %s663_s8), 63 }
   0xe   : > { %s664_s9 = sshll.u32 %s1110_s8, 3 }
   0xf   : > { %s775_s12 = scalar_lea.vmem %s1107_s0, %s664_s9  ;;  %s1006_s15 = scalar_lea.vmem %s1108_s1, %s664_s9 }
  0x10   : > { %v778_v0 = vld [vmem:[%s775_s12] sm:$0xff]  ;;  %v781_v1 = vld [vmem:[%s775_s12 + $0x10] sm:$0xff]  ;;  %v784_v2 = vld [vmem:[%s775_s12 + $0x8] sm:$0xff] }
  0x11   : > { %v153_v3 = vsel %vm152_vm0, %v778_v0, 0.0  ;;  %v159_v4 = vsel %vm152_vm0, %v781_v1, 0.0  ;;  %v791_v5 = vld [vmem:[%s775_s12 + $0x18] sm:$0xff]  ;;  %v156_v6 = vsel %vm152_vm0, %v784_v2, 0.0  ;;  %v798_v8 = vld [vmem:[%s775_s12 + $0x28] sm:$0xff]  ;;  %v801_v9 = vld [vmem:[%s775_s12 + $0x20] sm:$0xff] }
  0x12   : > { %154 = vadd.xlane.f32.xlu0 %v153_v3  ;;  %160 = vadd.xlane.f32.xlu1 %v159_v4  ;;  %v162_v7 = vsel %vm152_vm0, %v791_v5, 0.0  ;;  %v168_v10 = vsel %vm152_vm0, %v798_v8, 0.0  ;;  %v165_v11 = vsel %vm152_vm0, %v801_v9, 0.0  ;;  %v808_v12 = vld [vmem:[%s775_s12 + $0x38] sm:$0xff]  ;;  %v811_v13 = vld [vmem:[%s775_s12 + $0x30] sm:$0xff]  ;;  %v818_v16 = vld [vmem:[%s775_s12 + $0x48] sm:$0xff] }
  0x13   : > { %v174_v14 = vsel %vm152_vm0, %v808_v12, 0.0  ;;  %v171_v15 = vsel %vm152_vm0, %v811_v13, 0.0  ;;  %v821_v17 = vld [vmem:[%s775_s12 + $0x40] sm:$0xff]  ;;  %v180_v18 = vsel %vm152_vm0, %v818_v16, 0.0  ;;  %v828_v20 = vld [vmem:[%s775_s12 + $0x58] sm:$0xff]  ;;  %v831_v21 = vld [vmem:[%s775_s12 + $0x50] sm:$0xff] }
  0x14   : > { %v177_v19 = vsel %vm152_vm0, %v821_v17, 0.0  ;;  %v186_v22 = vsel %vm152_vm0, %v828_v20, 0.0  ;;  %v183_v23 = vsel %vm152_vm0, %v831_v21, 0.0  ;;  %v838_v24 = vld [vmem:[%s775_s12 + $0x68] sm:$0xff]  ;;  %v841_v25 = vld [vmem:[%s775_s12 + $0x60] sm:$0xff]  ;;  %v848_v28 = vld [vmem:[%s775_s12 + $0x78] sm:$0xff] }
  0x15   : > { %v192_v26 = vsel %vm152_vm0, %v838_v24, 0.0  ;;  %v189_v27 = vsel %vm152_vm0, %v841_v25, 0.0  ;;  %v851_v29 = vld [vmem:[%s775_s12 + $0x70] sm:$0xff]  ;;  %v198_v30 = vsel %vm152_vm0, %v848_v28, 0.0  ;;  %v858_v32 = vld [vmem:[%s775_s12 + $0x88] sm:$0xff]  ;;  %v861_v33 = vld [vmem:[%s775_s12 + $0x80] sm:$0xff] }
  0x16   : > { %157 = vadd.xlane.f32.xlu0 %v156_v6  ;;  %163 = vadd.xlane.f32.xlu1 %v162_v7  ;;  %v195_v31 = vsel %vm152_vm0, %v851_v29, 0.0  ;;  %v204_v34 = vsel %vm152_vm0, %v858_v32, 0.0  ;;  %v201_v35 = vsel %vm152_vm0, %v861_v33, 0.0  ;;  %v868_v36 = vld [vmem:[%s775_s12 + $0x98] sm:$0xff]  ;;  %v871_v37 = vld [vmem:[%s775_s12 + $0x90] sm:$0xff]  ;;  %v878_v40 = vld [vmem:[%s775_s12 + $0xa8] sm:$0xff] }
  0x17   : > { %v210_v38 = vsel %vm152_vm0, %v868_v36, 0.0  ;;  %v207_v39 = vsel %vm152_vm0, %v871_v37, 0.0  ;;  %v881_v41 = vld [vmem:[%s775_s12 + $0xa0] sm:$0xff]  ;;  %v216_v42 = vsel %vm152_vm0, %v878_v40, 0.0  ;;  %v888_v44 = vld [vmem:[%s775_s12 + $0xb8] sm:$0xff]  ;;  %v891_v45 = vld [vmem:[%s775_s12 + $0xb0] sm:$0xff] }
  0x18   : > { %v213_v43 = vsel %vm152_vm0, %v881_v41, 0.0  ;;  %v222_v46 = vsel %vm152_vm0, %v888_v44, 0.0  ;;  %v219_v47 = vsel %vm152_vm0, %v891_v45, 0.0  ;;  %v898_v48 = vld [vmem:[%s775_s12 + $0xc8] sm:$0xff]  ;;  %v901_v49 = vld [vmem:[%s775_s12 + $0xc0] sm:$0xff]  ;;  %v908_v52 = vld [vmem:[%s775_s12 + $0xd8] sm:$0xff] }
  0x19   : > { %v228_v50 = vsel %vm152_vm0, %v898_v48, 0.0  ;;  %v225_v51 = vsel %vm152_vm0, %v901_v49, 0.0  ;;  %v911_v53 = vld [vmem:[%s775_s12 + $0xd0] sm:$0xff]  ;;  %v234_v54 = vsel %vm152_vm0, %v908_v52, 0.0  ;;  %v918_v56 = vld [vmem:[%s775_s12 + $0xe8] sm:$0xff]  ;;  %v921_v57 = vld [vmem:[%s775_s12 + $0xe0] sm:$0xff] }
  0x1a   : > { %169 = vadd.xlane.f32.xlu1 %v168_v10  ;;  %166 = vadd.xlane.f32.xlu0 %v165_v11  ;;  %v231_v55 = vsel %vm152_vm0, %v911_v53, 0.0  ;;  %v240_v58 = vsel %vm152_vm0, %v918_v56, 0.0  ;;  %v237_v59 = vsel %vm152_vm0, %v921_v57, 0.0  ;;  %v928_v60 = vld [vmem:[%s775_s12 + $0xf8] sm:$0xff]  ;;  %v931_v61 = vld [vmem:[%s775_s12 + $0xf0] sm:$0xff] }
  0x1b   : > { %v246_v62 = vsel %vm152_vm0, %v928_v60, 0.0  ;;  %v243_v63 = vsel %vm152_vm0, %v931_v61, 0.0 }
  0x1e   : > { %175 = vadd.xlane.f32.xlu1 %v174_v14  ;;  %172 = vadd.xlane.f32.xlu0 %v171_v15 }
  0x22   : > { %181 = vadd.xlane.f32.xlu1 %v180_v18  ;;  %178 = vadd.xlane.f32.xlu0 %v177_v19 }
  0x26   : > { %187 = vadd.xlane.f32.xlu1 %v186_v22  ;;  %184 = vadd.xlane.f32.xlu0 %v183_v23 }
  0x2a   : > { %193 = vadd.xlane.f32.xlu1 %v192_v26  ;;  %190 = vadd.xlane.f32.xlu0 %v189_v27 }
  0x2e   : > { %199 = vadd.xlane.f32.xlu1 %v198_v30  ;;  %196 = vadd.xlane.f32.xlu0 %v195_v31 }
  0x32   : > { %205 = vadd.xlane.f32.xlu1 %v204_v34  ;;  %202 = vadd.xlane.f32.xlu0 %v201_v35 }
  0x36   : > { %211 = vadd.xlane.f32.xlu1 %v210_v38  ;;  %208 = vadd.xlane.f32.xlu0 %v207_v39 }
  0x3a   : > { %217 = vadd.xlane.f32.xlu1 %v216_v42  ;;  %214 = vadd.xlane.f32.xlu0 %v213_v43 }
  0x3e   : > { %223 = vadd.xlane.f32.xlu1 %v222_v46  ;;  %220 = vadd.xlane.f32.xlu0 %v219_v47 }
  0x42   : > { %229 = vadd.xlane.f32.xlu1 %v228_v50  ;;  %226 = vadd.xlane.f32.xlu0 %v225_v51 }
  0x46   : > { %235 = vadd.xlane.f32.xlu1 %v234_v54  ;;  %232 = vadd.xlane.f32.xlu0 %v231_v55 }
  0x4a   : > { %241 = vadd.xlane.f32.xlu1 %v240_v58  ;;  %238 = vadd.xlane.f32.xlu0 %v237_v59 }
  0x4e   : > { %247 = vadd.xlane.f32.xlu1 %v246_v62  ;;  %244 = vadd.xlane.f32.xlu0 %v243_v63 }
  0x9f   : > { %v155_v3 = vpop.xlane.xlu0 %154  ;;  %v161_v4 = vpop.xlane.xlu1 %160 }
  0xa0   : > { %v250_v6 = vmul.f32 0.020833334, %v155_v3  ;;  %v252_v7 = vmul.f32 0.020833334, %v161_v4 }
  0xa2   : > { %v282_v10 = vsub.f32 %v778_v0, %v250_v6  ;;  %v284_v11 = vsub.f32 %v781_v1, %v252_v7 }
  0xa3   : > { %v158_v14 = vpop.xlane.xlu0 %157  ;;  %v164_v15 = vpop.xlane.xlu1 %163 }
  0xa4   : > { %v251_v18 = vmul.f32 0.020833334, %v158_v14  ;;  %v253_v19 = vmul.f32 0.020833334, %v164_v15  ;;  %v314_v22 = vmul.f32 %v282_v10, %v282_v10  ;;  %v316_v23 = vmul.f32 %v284_v11, %v284_v11 }
  0xa6   : > { %v283_v26 = vsub.f32 %v784_v2, %v251_v18  ;;  %v285_v27 = vsub.f32 %v791_v5, %v253_v19  ;;  %v346_v30 = vsel %vm152_vm0, %v314_v22, 0.0  ;;  %v352_v34 = vsel %vm152_vm0, %v316_v23, 0.0 }
  0xa7   : > { %347 = vadd.xlane.f32.xlu0 %v346_v30  ;;  %v170_v31 = vpop.xlane.xlu1 %169  ;;  %v167_v35 = vpop.xlane.xlu0 %166 }
  0xa8   : > { %v255_v38 = vmul.f32 0.020833334, %v170_v31  ;;  %v315_v39 = vmul.f32 %v283_v26, %v283_v26  ;;  %v254_v42 = vmul.f32 0.020833334, %v167_v35  ;;  %v317_v43 = vmul.f32 %v285_v27, %v285_v27 }
  0xaa   : > { %v287_v46 = vsub.f32 %v798_v8, %v255_v38  ;;  %v349_v47 = vsel %vm152_vm0, %v315_v39, 0.0  ;;  %v286_v50 = vsub.f32 %v801_v9, %v254_v42  ;;  %v355_v54 = vsel %vm152_vm0, %v317_v43, 0.0 }
  0xab   : > { %353 = vadd.xlane.f32.xlu0 %v352_v34  ;;  %350 = vadd.xlane.f32.xlu1 %v349_v47  ;;  %v176_v51 = vpop.xlane.xlu1 %175  ;;  %v173_v55 = vpop.xlane.xlu0 %172 }
  0xac   : > { %v257_v58 = vmul.f32 0.020833334, %v176_v51  ;;  %v256_v59 = vmul.f32 0.020833334, %v173_v55  ;;  %v319_v62 = vmul.f32 %v287_v46, %v287_v46  ;;  %v318_v63 = vmul.f32 %v286_v50, %v286_v50 }
  0xae   : > { %v289_v3 = vsub.f32 %v808_v12, %v257_v58  ;;  %v288_v4 = vsub.f32 %v811_v13, %v256_v59  ;;  %v358_v6 = vsel %vm152_vm0, %v318_v63, 0.0  ;;  %v361_v10 = vsel %vm152_vm0, %v319_v62, 0.0 }
  0xaf   : > { %356 = vadd.xlane.f32.xlu1 %v355_v54  ;;  %v182_v7 = vpop.xlane.xlu1 %181  ;;  %359 = vadd.xlane.f32.xlu0 %v358_v6  ;;  %v179_v11 = vpop.xlane.xlu0 %178 }
  0xb0   : > { %v259_v14 = vmul.f32 0.020833334, %v182_v7  ;;  %v258_v15 = vmul.f32 0.020833334, %v179_v11  ;;  %v321_v18 = vmul.f32 %v289_v3, %v289_v3  ;;  %v320_v19 = vmul.f32 %v288_v4, %v288_v4 }
  0xb2   : > { %v291_v22 = vsub.f32 %v818_v16, %v259_v14  ;;  %v290_v23 = vsub.f32 %v821_v17, %v258_v15  ;;  %v364_v26 = vsel %vm152_vm0, %v320_v19, 0.0  ;;  %v367_v30 = vsel %vm152_vm0, %v321_v18, 0.0 }
  0xb3   : > { %362 = vadd.xlane.f32.xlu1 %v361_v10  ;;  %v188_v27 = vpop.xlane.xlu1 %187  ;;  %365 = vadd.xlane.f32.xlu0 %v364_v26  ;;  %v185_v31 = vpop.xlane.xlu0 %184 }
  0xb4   : > { %v261_v34 = vmul.f32 0.020833334, %v188_v27  ;;  %v260_v35 = vmul.f32 0.020833334, %v185_v31  ;;  %v323_v38 = vmul.f32 %v291_v22, %v291_v22  ;;  %v322_v39 = vmul.f32 %v290_v23, %v290_v23 }
  0xb6   : > { %v293_v42 = vsub.f32 %v828_v20, %v261_v34  ;;  %v292_v43 = vsub.f32 %v831_v21, %v260_v35  ;;  %v370_v46 = vsel %vm152_vm0, %v322_v39, 0.0  ;;  %v373_v50 = vsel %vm152_vm0, %v323_v38, 0.0 }
  0xb7   : > { %368 = vadd.xlane.f32.xlu1 %v367_v30  ;;  %v194_v47 = vpop.xlane.xlu1 %193  ;;  %371 = vadd.xlane.f32.xlu0 %v370_v46  ;;  %v191_v51 = vpop.xlane.xlu0 %190 }
  0xb8   : > { %v263_v54 = vmul.f32 0.020833334, %v194_v47  ;;  %v262_v55 = vmul.f32 0.020833334, %v191_v51  ;;  %v325_v58 = vmul.f32 %v293_v42, %v293_v42  ;;  %v324_v59 = vmul.f32 %v292_v43, %v292_v43 }
  0xba   : > { %v295_v62 = vsub.f32 %v838_v24, %v263_v54  ;;  %v294_v63 = vsub.f32 %v841_v25, %v262_v55  ;;  %v376_v3 = vsel %vm152_vm0, %v324_v59, 0.0  ;;  %v379_v6 = vsel %vm152_vm0, %v325_v58, 0.0 }
  0xbb   : > { %374 = vadd.xlane.f32.xlu1 %v373_v50  ;;  %v200_v4 = vpop.xlane.xlu1 %199  ;;  %377 = vadd.xlane.f32.xlu0 %v376_v3  ;;  %v197_v7 = vpop.xlane.xlu0 %196 }
  0xbc   : > { %v265_v10 = vmul.f32 0.020833334, %v200_v4  ;;  %v264_v11 = vmul.f32 0.020833334, %v197_v7  ;;  %v327_v14 = vmul.f32 %v295_v62, %v295_v62  ;;  %v326_v15 = vmul.f32 %v294_v63, %v294_v63 }
  0xbe   : > { %v297_v18 = vsub.f32 %v848_v28, %v265_v10  ;;  %v296_v19 = vsub.f32 %v851_v29, %v264_v11  ;;  %v382_v22 = vsel %vm152_vm0, %v326_v15, 0.0  ;;  %v385_v26 = vsel %vm152_vm0, %v327_v14, 0.0 }
  0xbf   : > { %380 = vadd.xlane.f32.xlu1 %v379_v6  ;;  %v206_v23 = vpop.xlane.xlu1 %205  ;;  %383 = vadd.xlane.f32.xlu0 %v382_v22  ;;  %v203_v27 = vpop.xlane.xlu0 %202 }
  0xc0   : > { %v267_v30 = vmul.f32 0.020833334, %v206_v23  ;;  %v266_v31 = vmul.f32 0.020833334, %v203_v27  ;;  %v329_v34 = vmul.f32 %v297_v18, %v297_v18  ;;  %v328_v35 = vmul.f32 %v296_v19, %v296_v19 }
  0xc2   : > { %v299_v38 = vsub.f32 %v858_v32, %v267_v30  ;;  %v298_v39 = vsub.f32 %v861_v33, %v266_v31  ;;  %v388_v42 = vsel %vm152_vm0, %v328_v35, 0.0  ;;  %v391_v46 = vsel %vm152_vm0, %v329_v34, 0.0 }
  0xc3   : > { %386 = vadd.xlane.f32.xlu1 %v385_v26  ;;  %v212_v43 = vpop.xlane.xlu1 %211  ;;  %389 = vadd.xlane.f32.xlu0 %v388_v42  ;;  %v209_v47 = vpop.xlane.xlu0 %208 }
  0xc4   : > { %v269_v50 = vmul.f32 0.020833334, %v212_v43  ;;  %v268_v51 = vmul.f32 0.020833334, %v209_v47  ;;  %v331_v54 = vmul.f32 %v299_v38, %v299_v38  ;;  %v330_v55 = vmul.f32 %v298_v39, %v298_v39 }
  0xc6   : > { %v301_v58 = vsub.f32 %v868_v36, %v269_v50  ;;  %v300_v59 = vsub.f32 %v871_v37, %v268_v51  ;;  %v394_v62 = vsel %vm152_vm0, %v330_v55, 0.0  ;;  %v397_v3 = vsel %vm152_vm0, %v331_v54, 0.0 }
  0xc7   : > { %392 = vadd.xlane.f32.xlu1 %v391_v46  ;;  %v218_v63 = vpop.xlane.xlu1 %217  ;;  %395 = vadd.xlane.f32.xlu0 %v394_v62  ;;  %v215_v4 = vpop.xlane.xlu0 %214 }
  0xc8   : > { %v271_v6 = vmul.f32 0.020833334, %v218_v63  ;;  %v270_v7 = vmul.f32 0.020833334, %v215_v4  ;;  %v333_v10 = vmul.f32 %v301_v58, %v301_v58  ;;  %v332_v11 = vmul.f32 %v300_v59, %v300_v59 }
  0xca   : > { %v303_v14 = vsub.f32 %v878_v40, %v271_v6  ;;  %v302_v15 = vsub.f32 %v881_v41, %v270_v7  ;;  %v400_v18 = vsel %vm152_vm0, %v332_v11, 0.0  ;;  %v403_v22 = vsel %vm152_vm0, %v333_v10, 0.0 }
  0xcb   : > { %398 = vadd.xlane.f32.xlu1 %v397_v3  ;;  %v224_v19 = vpop.xlane.xlu1 %223  ;;  %401 = vadd.xlane.f32.xlu0 %v400_v18  ;;  %v221_v23 = vpop.xlane.xlu0 %220 }
  0xcc   : > { %v273_v26 = vmul.f32 0.020833334, %v224_v19  ;;  %v272_v27 = vmul.f32 0.020833334, %v221_v23  ;;  %v335_v30 = vmul.f32 %v303_v14, %v303_v14  ;;  %v334_v31 = vmul.f32 %v302_v15, %v302_v15 }
  0xce   : > { %v305_v34 = vsub.f32 %v888_v44, %v273_v26  ;;  %v304_v35 = vsub.f32 %v891_v45, %v272_v27  ;;  %v406_v38 = vsel %vm152_vm0, %v334_v31, 0.0  ;;  %v409_v42 = vsel %vm152_vm0, %v335_v30, 0.0 }
  0xcf   : > { %404 = vadd.xlane.f32.xlu1 %v403_v22  ;;  %v230_v39 = vpop.xlane.xlu1 %229  ;;  %407 = vadd.xlane.f32.xlu0 %v406_v38  ;;  %v227_v43 = vpop.xlane.xlu0 %226 }
  0xd0   : > { %v275_v46 = vmul.f32 0.020833334, %v230_v39  ;;  %v274_v47 = vmul.f32 0.020833334, %v227_v43  ;;  %v337_v50 = vmul.f32 %v305_v34, %v305_v34  ;;  %v336_v51 = vmul.f32 %v304_v35, %v304_v35 }
  0xd2   : > { %v307_v54 = vsub.f32 %v898_v48, %v275_v46  ;;  %v306_v55 = vsub.f32 %v901_v49, %v274_v47  ;;  %v412_v58 = vsel %vm152_vm0, %v336_v51, 0.0  ;;  %v415_v62 = vsel %vm152_vm0, %v337_v50, 0.0 }
  0xd3   : > { %410 = vadd.xlane.f32.xlu1 %v409_v42  ;;  %v236_v59 = vpop.xlane.xlu1 %235  ;;  %413 = vadd.xlane.f32.xlu0 %v412_v58  ;;  %v233_v63 = vpop.xlane.xlu0 %232 }
  0xd4   : > { %v277_v3 = vmul.f32 0.020833334, %v236_v59  ;;  %v276_v4 = vmul.f32 0.020833334, %v233_v63  ;;  %v339_v6 = vmul.f32 %v307_v54, %v307_v54  ;;  %v338_v7 = vmul.f32 %v306_v55, %v306_v55 }
  0xd6   : > { %v309_v10 = vsub.f32 %v908_v52, %v277_v3  ;;  %v308_v11 = vsub.f32 %v911_v53, %v276_v4  ;;  %v418_v14 = vsel %vm152_vm0, %v338_v7, 0.0  ;;  %v421_v18 = vsel %vm152_vm0, %v339_v6, 0.0 }
  0xd7   : > { %416 = vadd.xlane.f32.xlu1 %v415_v62  ;;  %v242_v15 = vpop.xlane.xlu1 %241  ;;  %419 = vadd.xlane.f32.xlu0 %v418_v14  ;;  %v239_v19 = vpop.xlane.xlu0 %238 }
  0xd8   : > { %v279_v22 = vmul.f32 0.020833334, %v242_v15  ;;  %v278_v23 = vmul.f32 0.020833334, %v239_v19  ;;  %v341_v26 = vmul.f32 %v309_v10, %v309_v10  ;;  %v340_v27 = vmul.f32 %v308_v11, %v308_v11 }
  0xda   : > { %v311_v30 = vsub.f32 %v918_v56, %v279_v22  ;;  %v310_v31 = vsub.f32 %v921_v57, %v278_v23  ;;  %v424_v34 = vsel %vm152_vm0, %v340_v27, 0.0  ;;  %v427_v38 = vsel %vm152_vm0, %v341_v26, 0.0 }
  0xdb   : > { %422 = vadd.xlane.f32.xlu1 %v421_v18  ;;  %v248_v35 = vpop.xlane.xlu1 %247  ;;  %425 = vadd.xlane.f32.xlu0 %v424_v34  ;;  %v245_v39 = vpop.xlane.xlu0 %244 }
  0xdc   : > { %v281_v42 = vmul.f32 0.020833334, %v248_v35  ;;  %v280_v43 = vmul.f32 0.020833334, %v245_v39  ;;  %v343_v46 = vmul.f32 %v311_v30, %v311_v30  ;;  %v342_v47 = vmul.f32 %v310_v31, %v310_v31 }
  0xde   : > { %v313_v50 = vsub.f32 %v928_v60, %v281_v42  ;;  %v312_v51 = vsub.f32 %v931_v61, %v280_v43  ;;  %v430_v54 = vsel %vm152_vm0, %v342_v47, 0.0  ;;  %v433_v55 = vsel %vm152_vm0, %v343_v46, 0.0 }
  0xdf   : > { %428 = vadd.xlane.f32.xlu1 %v427_v38  ;;  %431 = vadd.xlane.f32.xlu0 %v430_v54 }
  0xe0   : > { %v345_v58 = vmul.f32 %v313_v50, %v313_v50  ;;  %v344_v59 = vmul.f32 %v312_v51, %v312_v51 }
  0xe2   : > { %v436_v62 = vsel %vm152_vm0, %v344_v59, 0.0  ;;  %v439_v63 = vsel %vm152_vm0, %v345_v58, 0.0 }
  0xe3   : > { %434 = vadd.xlane.f32.xlu1 %v433_v55  ;;  %437 = vadd.xlane.f32.xlu0 %v436_v62 }
  0xe7   : > { %440 = vadd.xlane.f32.xlu1 %v439_v63 }
 0x134   : > { %v348_v3 = vpop.xlane.xlu0 %347 }
 0x135   : > { %v442_v4 = vmul.f32 0.020833334, %v348_v3 }
 0x137   : > { %v474_v6 = vadd.f32 1e-05, %v442_v4 }
 0x138   : > { %v351_v7 = vpop.xlane.xlu1 %350  ;;  %v354_v10 = vpop.xlane.xlu0 %353 }
 0x139   : > { %677 = vrsqrt.f32 %v474_v6  ;;  %v443_v11 = vmul.f32 0.020833334, %v351_v7  ;;  %v444_v14 = vmul.f32 0.020833334, %v354_v10 }
 0x13b   : > { %v475_v15 = vadd.f32 1e-05, %v443_v11  ;;  %v476_v18 = vadd.f32 1e-05, %v444_v14 }
 0x13c   : > { %v357_v19 = vpop.xlane.xlu1 %356  ;;  %v360_v22 = vpop.xlane.xlu0 %359 }
 0x13d   : > { %679 = vrsqrt.f32 %v475_v15  ;;  %v445_v23 = vmul.f32 0.020833334, %v357_v19  ;;  %v446_v26 = vmul.f32 0.020833334, %v360_v22 }
 0x13e   : > { %681 = vrsqrt.f32 %v476_v18 }
 0x13f   : > { %v477_v27 = vadd.f32 1e-05, %v445_v23  ;;  %v478_v30 = vadd.f32 1e-05, %v446_v26 }
 0x140   : > { %v363_v31 = vpop.xlane.xlu1 %362  ;;  %v366_v34 = vpop.xlane.xlu0 %365 }
 0x141   : > { %683 = vrsqrt.f32 %v477_v27  ;;  %v447_v35 = vmul.f32 0.020833334, %v363_v31  ;;  %v448_v38 = vmul.f32 0.020833334, %v366_v34 }
 0x142   : > { %685 = vrsqrt.f32 %v478_v30 }
 0x143   : > { %v678_v39 = vpop.eup %677  ;;  %v479_v42 = vadd.f32 1e-05, %v447_v35  ;;  %v480_v43 = vadd.f32 1e-05, %v448_v38 }
 0x144   : > { %v538_v46 = vmul.f32 %v678_v39, %v778_v0  ;;  %v369_v47 = vpop.xlane.xlu1 %368  ;;  %v372_v50 = vpop.xlane.xlu0 %371 }
 0x145   : > { %687 = vrsqrt.f32 %v479_v42  ;;  %v449_v51 = vmul.f32 0.020833334, %v369_v47  ;;  %v450_v54 = vmul.f32 0.020833334, %v372_v50 }
 0x146   : > { %570 = vst.msk [vmem:[%s1006_s15] sm:$0xff] %vm152_vm0, %v538_v46  ;;  %689 = vrsqrt.f32 %v480_v43 }
 0x147   : > { %v680_v55 = vpop.eup %679  ;;  %v481_v58 = vadd.f32 1e-05, %v449_v51  ;;  %v482_v59 = vadd.f32 1e-05, %v450_v54 }
 0x148   : > { %v682_v62 = vpop.eup %681  ;;  %v539_v63 = vmul.f32 %v680_v55, %v784_v2  ;;  %v375_v3 = vpop.xlane.xlu1 %374 }
 0x149   : > { %v378_v4 = vpop.xlane.xlu0 %377  ;;  %v540_v0 = vmul.f32 %v682_v62, %v781_v1  ;;  %691 = vrsqrt.f32 %v481_v58  ;;  %v451_v6 = vmul.f32 0.020833334, %v375_v3 }
 0x14a   : > { %v452_v7 = vmul.f32 0.020833334, %v378_v4  ;;  %571 = vst.msk [vmem:[%s1006_s15 + $0x8] sm:$0xff] %vm152_vm0, %v539_v63  ;;  %693 = vrsqrt.f32 %v482_v59 }
 0x14b   : > { %v684_v10 = vpop.eup %683  ;;  %572 = vst.msk [vmem:[%s1006_s15 + $0x10] sm:$0xff] %vm152_vm0, %v540_v0  ;;  %v483_v11 = vadd.f32 1e-05, %v451_v6 }
 0x14c   : > { %v484_v14 = vadd.f32 1e-05, %v452_v7  ;;  %v686_v15 = vpop.eup %685  ;;  %v541_v2 = vmul.f32 %v684_v10, %v791_v5  ;;  %v381_v18 = vpop.xlane.xlu1 %380 }
 0x14d   : > { %v384_v19 = vpop.xlane.xlu0 %383  ;;  %v542_v1 = vmul.f32 %v686_v15, %v801_v9  ;;  %695 = vrsqrt.f32 %v483_v11  ;;  %v453_v22 = vmul.f32 0.020833334, %v381_v18 }
 0x14e   : > { %v454_v23 = vmul.f32 0.020833334, %v384_v19  ;;  %573 = vst.msk [vmem:[%s1006_s15 + $0x18] sm:$0xff] %vm152_vm0, %v541_v2  ;;  %697 = vrsqrt.f32 %v484_v14 }
 0x14f   : > { %v688_v26 = vpop.eup %687  ;;  %574 = vst.msk [vmem:[%s1006_s15 + $0x20] sm:$0xff] %vm152_vm0, %v542_v1  ;;  %v485_v27 = vadd.f32 1e-05, %v453_v22 }
 0x150   : > { %v486_v30 = vadd.f32 1e-05, %v454_v23  ;;  %v690_v31 = vpop.eup %689  ;;  %v543_v5 = vmul.f32 %v688_v26, %v798_v8  ;;  %v387_v34 = vpop.xlane.xlu1 %386 }
 0x151   : > { %v390_v35 = vpop.xlane.xlu0 %389  ;;  %v544_v9 = vmul.f32 %v690_v31, %v811_v13  ;;  %699 = vrsqrt.f32 %v485_v27  ;;  %v455_v38 = vmul.f32 0.020833334, %v387_v34 }
 0x152   : > { %v456_v39 = vmul.f32 0.020833334, %v390_v35  ;;  %575 = vst.msk [vmem:[%s1006_s15 + $0x28] sm:$0xff] %vm152_vm0, %v543_v5  ;;  %701 = vrsqrt.f32 %v486_v30 }
 0x153   : > { %v692_v42 = vpop.eup %691  ;;  %576 = vst.msk [vmem:[%s1006_s15 + $0x30] sm:$0xff] %vm152_vm0, %v544_v9  ;;  %v487_v43 = vadd.f32 1e-05, %v455_v38 }
 0x154   : > { %v488_v46 = vadd.f32 1e-05, %v456_v39  ;;  %v694_v47 = vpop.eup %693  ;;  %v545_v8 = vmul.f32 %v692_v42, %v808_v12  ;;  %v393_v50 = vpop.xlane.xlu1 %392 }
 0x155   : > { %v396_v51 = vpop.xlane.xlu0 %395  ;;  %v546_v13 = vmul.f32 %v694_v47, %v821_v17  ;;  %703 = vrsqrt.f32 %v487_v43  ;;  %v457_v54 = vmul.f32 0.020833334, %v393_v50 }
 0x156   : > { %v458_v55 = vmul.f32 0.020833334, %v396_v51  ;;  %577 = vst.msk [vmem:[%s1006_s15 + $0x38] sm:$0xff] %vm152_vm0, %v545_v8  ;;  %705 = vrsqrt.f32 %v488_v46 }
 0x157   : > { %v696_v58 = vpop.eup %695  ;;  %578 = vst.msk [vmem:[%s1006_s15 + $0x40] sm:$0xff] %vm152_vm0, %v546_v13  ;;  %v489_v59 = vadd.f32 1e-05, %v457_v54 }
 0x158   : > { %v490_v62 = vadd.f32 1e-05, %v458_v55  ;;  %v698_v63 = vpop.eup %697  ;;  %v547_v12 = vmul.f32 %v696_v58, %v818_v16  ;;  %v399_v3 = vpop.xlane.xlu1 %398 }
 0x159   : > { %v402_v4 = vpop.xlane.xlu0 %401  ;;  %v548_v17 = vmul.f32 %v698_v63, %v831_v21  ;;  %707 = vrsqrt.f32 %v489_v59  ;;  %v459_v0 = vmul.f32 0.020833334, %v399_v3 }
 0x15a   : > { %v460_v6 = vmul.f32 0.020833334, %v402_v4  ;;  %579 = vst.msk [vmem:[%s1006_s15 + $0x48] sm:$0xff] %vm152_vm0, %v547_v12  ;;  %709 = vrsqrt.f32 %v490_v62 }
 0x15b   : > { %v700_v7 = vpop.eup %699  ;;  %580 = vst.msk [vmem:[%s1006_s15 + $0x50] sm:$0xff] %vm152_vm0, %v548_v17  ;;  %v491_v10 = vadd.f32 1e-05, %v459_v0 }
 0x15c   : > { %v492_v11 = vadd.f32 1e-05, %v460_v6  ;;  %v702_v14 = vpop.eup %701  ;;  %v549_v16 = vmul.f32 %v700_v7, %v828_v20  ;;  %v405_v15 = vpop.xlane.xlu1 %404 }
 0x15d   : > { %v408_v2 = vpop.xlane.xlu0 %407  ;;  %v550_v21 = vmul.f32 %v702_v14, %v841_v25  ;;  %711 = vrsqrt.f32 %v491_v10  ;;  %v461_v18 = vmul.f32 0.020833334, %v405_v15 }
 0x15e   : > { %v462_v19 = vmul.f32 0.020833334, %v408_v2  ;;  %581 = vst.msk [vmem:[%s1006_s15 + $0x58] sm:$0xff] %vm152_vm0, %v549_v16  ;;  %713 = vrsqrt.f32 %v492_v11 }
 0x15f   : > { %v704_v1 = vpop.eup %703  ;;  %582 = vst.msk [vmem:[%s1006_s15 + $0x60] sm:$0xff] %vm152_vm0, %v550_v21  ;;  %v493_v22 = vadd.f32 1e-05, %v461_v18 }
 0x160   : > { %v494_v23 = vadd.f32 1e-05, %v462_v19  ;;  %v706_v26 = vpop.eup %705  ;;  %v551_v20 = vmul.f32 %v704_v1, %v838_v24  ;;  %v411_v27 = vpop.xlane.xlu1 %410 }
 0x161   : > { %v414_v30 = vpop.xlane.xlu0 %413  ;;  %v552_v25 = vmul.f32 %v706_v26, %v851_v29  ;;  %715 = vrsqrt.f32 %v493_v22  ;;  %v463_v31 = vmul.f32 0.020833334, %v411_v27 }
 0x162   : > { %v464_v5 = vmul.f32 0.020833334, %v414_v30  ;;  %583 = vst.msk [vmem:[%s1006_s15 + $0x68] sm:$0xff] %vm152_vm0, %v551_v20  ;;  %717 = vrsqrt.f32 %v494_v23 }
 0x163   : > { %v708_v34 = vpop.eup %707  ;;  %584 = vst.msk [vmem:[%s1006_s15 + $0x70] sm:$0xff] %vm152_vm0, %v552_v25  ;;  %v495_v35 = vadd.f32 1e-05, %v463_v31 }
 0x164   : > { %v496_v9 = vadd.f32 1e-05, %v464_v5  ;;  %v710_v38 = vpop.eup %709  ;;  %v553_v24 = vmul.f32 %v708_v34, %v848_v28  ;;  %v417_v39 = vpop.xlane.xlu1 %416 }
 0x165   : > { %v420_v42 = vpop.xlane.xlu0 %419  ;;  %v554_v29 = vmul.f32 %v710_v38, %v861_v33  ;;  %719 = vrsqrt.f32 %v495_v35  ;;  %v465_v43 = vmul.f32 0.020833334, %v417_v39 }
 0x166   : > { %v466_v46 = vmul.f32 0.020833334, %v420_v42  ;;  %585 = vst.msk [vmem:[%s1006_s15 + $0x78] sm:$0xff] %vm152_vm0, %v553_v24  ;;  %721 = vrsqrt.f32 %v496_v9 }
 0x167   : > { %v712_v47 = vpop.eup %711  ;;  %586 = vst.msk [vmem:[%s1006_s15 + $0x80] sm:$0xff] %vm152_vm0, %v554_v29  ;;  %v497_v8 = vadd.f32 1e-05, %v465_v43 }
 0x168   : > { %v498_v50 = vadd.f32 1e-05, %v466_v46  ;;  %v714_v51 = vpop.eup %713  ;;  %v555_v28 = vmul.f32 %v712_v47, %v858_v32  ;;  %v423_v13 = vpop.xlane.xlu1 %422 }
 0x169   : > { %v426_v54 = vpop.xlane.xlu0 %425  ;;  %v556_v33 = vmul.f32 %v714_v51, %v871_v37  ;;  %723 = vrsqrt.f32 %v497_v8  ;;  %v467_v55 = vmul.f32 0.020833334, %v423_v13 }
 0x16a   : > { %v468_v58 = vmul.f32 0.020833334, %v426_v54  ;;  %587 = vst.msk [vmem:[%s1006_s15 + $0x88] sm:$0xff] %vm152_vm0, %v555_v28  ;;  %725 = vrsqrt.f32 %v498_v50 }
 0x16b   : > { %v716_v59 = vpop.eup %715  ;;  %588 = vst.msk [vmem:[%s1006_s15 + $0x90] sm:$0xff] %vm152_vm0, %v556_v33  ;;  %v499_v62 = vadd.f32 1e-05, %v467_v55 }
 0x16c   : > { %v500_v63 = vadd.f32 1e-05, %v468_v58  ;;  %v718_v12 = vpop.eup %717  ;;  %v557_v32 = vmul.f32 %v716_v59, %v868_v36  ;;  %v429_v3 = vpop.xlane.xlu1 %428 }
 0x16d   : > { %v432_v4 = vpop.xlane.xlu0 %431  ;;  %v558_v37 = vmul.f32 %v718_v12, %v881_v41  ;;  %727 = vrsqrt.f32 %v499_v62  ;;  %v469_v17 = vmul.f32 0.020833334, %v429_v3 }
 0x16e   : > { %v470_v0 = vmul.f32 0.020833334, %v432_v4  ;;  %589 = vst.msk [vmem:[%s1006_s15 + $0x98] sm:$0xff] %vm152_vm0, %v557_v32  ;;  %729 = vrsqrt.f32 %v500_v63 }
 0x16f   : > { %v720_v6 = vpop.eup %719  ;;  %590 = vst.msk [vmem:[%s1006_s15 + $0xa0] sm:$0xff] %vm152_vm0, %v558_v37  ;;  %v501_v7 = vadd.f32 1e-05, %v469_v17 }
 0x170   : > { %v502_v10 = vadd.f32 1e-05, %v470_v0  ;;  %v722_v11 = vpop.eup %721  ;;  %v559_v36 = vmul.f32 %v720_v6, %v878_v40  ;;  %v435_v14 = vpop.xlane.xlu1 %434 }
 0x171   : > { %v438_v16 = vpop.xlane.xlu0 %437  ;;  %v560_v41 = vmul.f32 %v722_v11, %v891_v45  ;;  %731 = vrsqrt.f32 %v501_v7  ;;  %v471_v15 = vmul.f32 0.020833334, %v435_v14 }
 0x172   : > { %v472_v2 = vmul.f32 0.020833334, %v438_v16  ;;  %591 = vst.msk [vmem:[%s1006_s15 + $0xa8] sm:$0xff] %vm152_vm0, %v559_v36  ;;  %733 = vrsqrt.f32 %v502_v10 }
 0x173   : > { %v724_v21 = vpop.eup %723  ;;  %592 = vst.msk [vmem:[%s1006_s15 + $0xb0] sm:$0xff] %vm152_vm0, %v560_v41  ;;  %v503_v18 = vadd.f32 1e-05, %v471_v15 }
 0x174   : > { %v504_v19 = vadd.f32 1e-05, %v472_v2  ;;  %v726_v1 = vpop.eup %725  ;;  %v561_v40 = vmul.f32 %v724_v21, %v888_v44  ;;  %v441_v22 = vpop.xlane.xlu1 %440 }
 0x175   : > { %v562_v45 = vmul.f32 %v726_v1, %v901_v49  ;;  %735 = vrsqrt.f32 %v503_v18  ;;  %v473_v23 = vmul.f32 0.020833334, %v441_v22 }
 0x176   : > { %593 = vst.msk [vmem:[%s1006_s15 + $0xb8] sm:$0xff] %vm152_vm0, %v561_v40  ;;  %737 = vrsqrt.f32 %v504_v19 }
 0x177   : > { %v728_v26 = vpop.eup %727  ;;  %594 = vst.msk [vmem:[%s1006_s15 + $0xc0] sm:$0xff] %vm152_vm0, %v562_v45  ;;  %v505_v20 = vadd.f32 1e-05, %v473_v23 }
 0x178   : > { %v730_v27 = vpop.eup %729  ;;  %v563_v30 = vmul.f32 %v728_v26, %v898_v48 }
 0x179   : > { %v564_v44 = vmul.f32 %v730_v27, %v911_v53  ;;  %739 = vrsqrt.f32 %v505_v20 }
 0x17a   : > { %595 = vst.msk [vmem:[%s1006_s15 + $0xc8] sm:$0xff] %vm152_vm0, %v563_v30 }
 0x17b   : > { %v732_v49 = vpop.eup %731  ;;  %596 = vst.msk [vmem:[%s1006_s15 + $0xd0] sm:$0xff] %vm152_vm0, %v564_v44 }
 0x17c   : > { %v734_v25 = vpop.eup %733  ;;  %v565_v31 = vmul.f32 %v732_v49, %v908_v52 }
 0x17d   : > { %v566_v5 = vmul.f32 %v734_v25, %v921_v57 }
 0x17e   : > { %597 = vst.msk [vmem:[%s1006_s15 + $0xd8] sm:$0xff] %vm152_vm0, %v565_v31 }
 0x17f   : > { %v736_v34 = vpop.eup %735  ;;  %598 = vst.msk [vmem:[%s1006_s15 + $0xe0] sm:$0xff] %vm152_vm0, %v566_v5 }
 0x180   : > { %v738_v48 = vpop.eup %737  ;;  %v567_v53 = vmul.f32 %v736_v34, %v918_v56 }
 0x181   : > { %v568_v35 = vmul.f32 %v738_v48, %v931_v61 }
 0x182   : > { %599 = vst.msk [vmem:[%s1006_s15 + $0xe8] sm:$0xff] %vm152_vm0, %v567_v53 }
 0x183   : > { %v740_v9 = vpop.eup %739  ;;  %600 = vst.msk [vmem:[%s1006_s15 + $0xf0] sm:$0xff] %vm152_vm0, %v568_v35 }
 0x184   : > { %v569_v38 = vmul.f32 %v740_v9, %v928_v60 }
 0x186   : > { %601 = vst.msk [vmem:[%s1006_s15 + $0xf8] sm:$0xff] %vm152_vm0, %v569_v38 }
 0x187 PF: > { %s11_s6 = sadd.s32 1, %s747_s6  }
 0x188   : > { %p8_p4 = scmp.ge.s32.totalorder %s11_s6, 4  }
 0x18a   :  { %10 = sbr.rel (!%p8_p4) target bundleno = 1 (0x1), region = 54 }

</bundles_post_ra>
